<compile_context>
chip_gen: v7x
topology: tpu7x:2x2x1
jax: 0.10.0
libtpu: 0.0.40
codegen_flags: <defaults>
</compile_context>

<pallas_src>
import jax
import jax.numpy as jnp
from jax import lax
from jax.experimental import pallas as pl
from jax.experimental.pallas import tpu as pltpu

TM_MAX = 2048   # hard cap on rows (N*Hout*Wout) per grid step (VMEM budget caps further)


# ---------------- Pallas kernels (hot path) ----------------

def _make_kernel(relu, has_residual):
    """Fused (x @ W)*scale + shift [+ residual] [+ ReLU] kernel (static variants)."""
    if has_residual:
        def kernel(x_ref, w_ref, scale_ref, shift_ref, bx_ref, o_ref):
            y = jnp.dot(x_ref[...], w_ref[...],
                        preferred_element_type=jnp.float32)
            y = y * scale_ref[...] + shift_ref[...] + bx_ref[...]
            if relu:
                y = jnp.maximum(y, 0.0)
            o_ref[...] = y.astype(o_ref.dtype)
    else:
        def kernel(x_ref, w_ref, scale_ref, shift_ref, o_ref):
            y = jnp.dot(x_ref[...], w_ref[...],
                        preferred_element_type=jnp.float32)
            y = y * scale_ref[...] + shift_ref[...]
            if relu:
                y = jnp.maximum(y, 0.0)
            o_ref[...] = y.astype(o_ref.dtype)
    return kernel


# ---------------- glue helpers (plain JAX / python) ----------------

def _round_up(n, m):
    return ((n + m - 1) // m) * m


def _vmem_budget():
    """(buffer budget bytes, vmem_limit_bytes) derived from the chip's VMEM."""
    cap = 64 << 20                      # conservative default (v7x-sized)
    try:
        cap = int(pltpu.get_tpu_info().vmem_capacity_bytes)
    except Exception:
        pass
    budget = min(int(cap * 0.55), 80 << 20)
    limit = max(32 << 20, min(int(cap * 0.75), 100 << 20))
    return budget, limit


def _pick_tn(Coutp, Kp, in_bytes, out_bytes, has_residual, budget):
    """Widest output-column tile whose weight slab fits the VMEM budget."""
    for tn in (Coutp, 256, 128):
        if tn > Coutp or Coutp % tn:
            continue
        fixed = 2 * Kp * tn * in_bytes + 4 * tn * 4            # weight + scale/shift
        per_row = Kp * in_bytes + tn * out_bytes + (tn * 4 if has_residual else 0)
        if fixed + 2 * 128 * per_row <= budget:
            return tn
    return 128


def _pick_tm(M, Kp, tn, in_bytes, out_bytes, has_residual, budget):
    """Row tile: as large as the VMEM budget allows, but avoid over-padding M."""
    fixed = 2 * Kp * tn * in_bytes + 4 * tn * 4
    per_row = 2 * (Kp * in_bytes + tn * out_bytes + (tn * 4 if has_residual else 0))
    avail = max(budget - fixed, per_row * 128)
    tm_cap = max(128, min(TM_MAX, (avail // per_row) // 128 * 128))
    ntiles = -(-M // tm_cap)
    tm = _round_up(-(-M // ntiles), 128)     # split M evenly -> last tile isn't mostly pad
    return min(tm, tm_cap)


def _im2col(x_nhwc, ksize, stride, padding):
    N, H, W, C = x_nhwc.shape
    xp = jnp.pad(x_nhwc, ((0, 0), (padding, padding), (padding, padding), (0, 0)))
    Hout = (H + 2 * padding - ksize) // stride + 1
    Wout = (W + 2 * padding - ksize) // stride + 1
    cols = []
    for kh in range(ksize):
        for kw in range(ksize):
            cols.append(xp[:, kh:kh + Hout * stride:stride,
                           kw:kw + Wout * stride:stride, :])
    patches = jnp.stack(cols, axis=3)              # (N, Hout, Wout, K*K, C)
    return patches.reshape(N * Hout * Wout, ksize * ksize * C), Hout, Wout


def _bn_affine(gamma, beta, mean, var, eps=1e-5):
    scale = gamma / jnp.sqrt(var + eps)
    shift = beta - mean * scale
    return scale, shift


def _prepare_matmul_weights(w2d, scale, shift, compute_dtype):
    """Pad K/Cout to lane multiples, cast weight to compute dtype (done ONCE)."""
    K, Cout = w2d.shape
    Kp = _round_up(K, 128)
    Coutp = _round_up(Cout, 128)
    wp = jnp.pad(w2d, ((0, Kp - K), (0, Coutp - Cout))).astype(compute_dtype)
    scalep = jnp.pad(scale.reshape(1, -1).astype(jnp.float32),
                     ((0, 0), (0, Coutp - Cout)))
    shiftp = jnp.pad(shift.reshape(1, -1).astype(jnp.float32),
                     ((0, 0), (0, Coutp - Cout)))
    return dict(w=wp, scale=scalep, shift=shiftp,
                K=K, Cout=Cout, Kp=Kp, Coutp=Coutp)


def _fused_matmul(x2d, prep, *, bx2d=None, relu=False, out_dtype=jnp.float32):
    """out = [relu]( (x2d @ W)*scale + shift [+ bx2d] ) with prepared weights."""
    M, K = x2d.shape
    assert K == prep["K"], (K, prep["K"])
    Kp, Coutp = prep["Kp"], prep["Coutp"]
    wp, scalep, shiftp = prep["w"], prep["scale"], prep["shift"]
    has_residual = bx2d is not None

    in_bytes = jnp.dtype(wp.dtype).itemsize
    out_bytes = jnp.dtype(out_dtype).itemsize
    budget, vmem_limit = _vmem_budget()
    tn = _pick_tn(Coutp, Kp, in_bytes, out_bytes, has_residual, budget)
    tm = _pick_tm(M, Kp, tn, in_bytes, out_bytes, has_residual, budget)
    Mp = _round_up(M, tm)

    xp = jnp.pad(x2d.astype(wp.dtype), ((0, Mp - M), (0, Kp - K)))
    args = [xp, wp, scalep, shiftp]
    if has_residual:
        bxp = jnp.pad(bx2d.astype(jnp.float32),
                      ((0, Mp - M), (0, Coutp - bx2d.shape[1])))
        args.append(bxp)

    kernel = _make_kernel(relu, has_residual)
    nrow = Mp // tm

    if tn == Coutp:
        # Weight / scale / shift resident in VMEM (constant index_map -> DMA'd
        # once); 1-D grid over row tiles; lane-dense (tm, Coutp) output slab.
        grid = (nrow,)
        in_specs = [
            pl.BlockSpec((tm, Kp), lambda i: (i, 0)),
            pl.BlockSpec((Kp, Coutp), lambda i: (0, 0)),
            pl.BlockSpec((1, Coutp), lambda i: (0, 0)),
            pl.BlockSpec((1, Coutp), lambda i: (0, 0)),
        ]
        if has_residual:
            in_specs.append(pl.BlockSpec((tm, Coutp), lambda i: (i, 0)))
        out_spec = pl.BlockSpec((tm, Coutp), lambda i: (i, 0))
        dims = ("parallel",)
    else:
        # Weight too large for residency: tile Cout, row axis innermost so each
        # weight column tile is only DMA'd once (block index unchanged across i).
        ncol = Coutp // tn
        grid = (ncol, nrow)
        in_specs = [
            pl.BlockSpec((tm, Kp), lambda j, i: (i, 0)),
            pl.BlockSpec((Kp, tn), lambda j, i: (0, j)),
            pl.BlockSpec((1, tn), lambda j, i: (0, j)),
            pl.BlockSpec((1, tn), lambda j, i: (0, j)),
        ]
        if has_residual:
            in_specs.append(pl.BlockSpec((tm, tn), lambda j, i: (i, j)))
        out_spec = pl.BlockSpec((tm, tn), lambda j, i: (i, j))
        dims = ("parallel", "parallel")

    out = pl.pallas_call(
        kernel,
        out_shape=jax.ShapeDtypeStruct((Mp, Coutp), out_dtype),
        grid=grid,
        in_specs=in_specs,
        out_specs=out_spec,
        compiler_params=pltpu.CompilerParams(
            dimension_semantics=dims,
            vmem_limit_bytes=int(vmem_limit)),
    )(*args)
    return out[:M, :prep["Cout"]]


# ---------------- ResNet block: prepare (once) + apply (hot path) ----------------

def prepare_resnet_block(params, stride, compute_dtype=jnp.bfloat16):
    """Fold bias/BN, transpose/pad/cast weights once (hoisted off the hot path)."""
    Cout, Cin = params["w1"].shape[0], params["w1"].shape[1]
    s_bn, t_bn = _bn_affine(params["bn_gamma"], params["bn_beta"],
                            params["bn_mean"], params["bn_var"])

    # conv1 (3x3, pad 1, stride): bias folded into shift, BN scale in epilogue
    w1_2d = jnp.transpose(params["w1"], (2, 3, 1, 0)).reshape(9 * Cin, Cout)
    prep1 = _prepare_matmul_weights(w1_2d, s_bn, params["b1"] * s_bn + t_bn,
                                    compute_dtype)

    w2_2d = jnp.transpose(params["w2"], (2, 3, 1, 0)).reshape(9 * Cout, Cout)
    if stride != 1:
        # Projection bypass (1x1 conv + BN) merged into one contraction:
        # both BN scales folded into the (f32) weights before the cast, so the
        # merged epilogue uses scale == 1.
        s_bp, t_bp = _bn_affine(params["bnbp_gamma"], params["bnbp_beta"],
                                params["bnbp_mean"], params["bnbp_var"])
        wbp_2d = jnp.transpose(params["w_bp"], (2, 3, 1, 0)).reshape(Cin, Cout)
        wcat = jnp.concatenate([w2_2d * s_bn[None, :],
                                wbp_2d * s_bp[None, :]], axis=0)
        prep2 = _prepare_matmul_weights(
            wcat, jnp.ones_like(s_bn), params["b2"] * s_bn + t_bn + t_bp,
            compute_dtype)
    else:
        prep2 = _prepare_matmul_weights(w2_2d, s_bn,
                                        params["b2"] * s_bn + t_bn, compute_dtype)
    return dict(conv1=prep1, conv2=prep2, stride=stride, Cin=Cin, Cout=Cout,
                compute_dtype=compute_dtype)


def resnet_block_apply_nhwc(x_nhwc, prep):
    """Hot path: NHWC in, NHWC out (f32). Dropout is identity (eval mode)."""
    stride, Cin, Cout = prep["stride"], prep["Cin"], prep["Cout"]
    cdt = prep["compute_dtype"]
    N, H, W, C = x_nhwc.shape
    assert C == Cin, (C, Cin)
    inter_dtype = cdt  # conv1 output emitted in compute dtype (halves writeback)

    # conv1 (3x3, pad 1, stride) + BN; dropout == identity
    p1, H1, W1 = _im2col(x_nhwc, 3, stride, 1)
    y1 = _fused_matmul(p1, prep["conv1"], relu=False, out_dtype=inter_dtype)
    y1 = y1.reshape(N, H1, W1, Cout)

    # conv2 (3x3, pad 1, stride 1) + BN + bypass + ReLU
    p2, H2, W2 = _im2col(y1, 3, 1, 1)
    if stride != 1:
        # projection bypass merged into the same contraction (one MXU pass)
        bx = x_nhwc[:, ::stride, ::stride, :].reshape(N * H2 * W2, Cin)
        xcat = jnp.concatenate([p2, bx.astype(p2.dtype)], axis=1)
        out = _fused_matmul(xcat, prep["conv2"], relu=True, out_dtype=jnp.float32)
    else:
        # identity bypass: residual added in the f32 kernel epilogue
        assert Cin == Cout, "identity bypass requires in_channels == out_channels"
        bx = x_nhwc.reshape(N * H2 * W2, Cin)
        out = _fused_matmul(p2, prep["conv2"], bx2d=bx, relu=True,
                            out_dtype=jnp.float32)
    return out.reshape(N, H2, W2, Cout)


def resnet_block_forward(x_nchw, params, stride, compute_dtype=jnp.bfloat16):
    prep = prepare_resnet_block(params, stride, compute_dtype)
    x = jnp.transpose(x_nchw, (0, 2, 3, 1)).astype(jnp.float32)   # NHWC
    out = resnet_block_apply_nhwc(x, prep)
    return jnp.transpose(out, (0, 3, 1, 2))                       # back to NCHW


# ---------------- pure-JAX reference ----------------

def reference_forward(x, params, stride, eps=1e-5):
    def conv(x, w, b, s, pad):
        y = lax.conv_general_dilated(
            x, w, window_strides=(s, s), padding=((pad, pad), (pad, pad)),
            dimension_numbers=("NCHW", "OIHW", "NCHW"))
        if b is not None:
            y = y + b.reshape(1, -1, 1, 1)
        return y

    def bn(x, g, b, m, v):
        return (g.reshape(1, -1, 1, 1) * (x - m.reshape(1, -1, 1, 1))
                / jnp.sqrt(v.reshape(1, -1, 1, 1) + eps) + b.reshape(1, -1, 1, 1))

    inp = x
    x = conv(x, params["w1"], params["b1"], stride, 1)
    x = bn(x, params["bn_gamma"], params["bn_beta"], params["bn_mean"], params["bn_var"])
    x = conv(x, params["w2"], params["b2"], 1, 1)
    x = bn(x, params["bn_gamma"], params["bn_beta"], params["bn_mean"], params["bn_var"])
    if stride != 1:
        bp = conv(inp, params["w_bp"], None, stride, 0)
        bp = bn(bp, params["bnbp_gamma"], params["bnbp_beta"],
                params["bnbp_mean"], params["bnbp_var"])
    else:
        bp = inp
    return jnp.maximum(x + bp, 0.0)


if __name__ == "__main__":
    key = jax.random.PRNGKey(0)
    keys = jax.random.split(key, 28)

    def make_params(ks, Cin, Cout):
        return dict(
            w1=0.1 * jax.random.normal(ks[0], (Cout, Cin, 3, 3), jnp.float32),
            b1=0.1 * jax.random.normal(ks[1], (Cout,), jnp.float32),
            w2=0.1 * jax.random.normal(ks[2], (Cout, Cout, 3, 3), jnp.float32),
            b2=0.1 * jax.random.normal(ks[3], (Cout,), jnp.float32),
            bn_gamma=1.0 + 0.1 * jax.random.normal(ks[4], (Cout,), jnp.float32),
            bn_beta=0.1 * jax.random.normal(ks[5], (Cout,), jnp.float32),
            bn_mean=0.1 * jax.random.normal(ks[6], (Cout,), jnp.float32),
            bn_var=jnp.abs(jax.random.normal(ks[7], (Cout,), jnp.float32)) + 0.5,
            w_bp=0.1 * jax.random.normal(ks[8], (Cout, Cin, 1, 1), jnp.float32),
            bnbp_gamma=1.0 + 0.1 * jax.random.normal(ks[9], (Cout,), jnp.float32),
            bnbp_beta=0.1 * jax.random.normal(ks[10], (Cout,), jnp.float32),
            bnbp_mean=0.1 * jax.random.normal(ks[11], (Cout,), jnp.float32),
            bnbp_var=jnp.abs(jax.random.normal(ks[12], (Cout,), jnp.float32)) + 0.5,
        )

    # Case 1: stride=2 block (projection bypass merged into the matmul)
    N, Cin, Cout, H, W, stride = 2, 4, 8, 16, 16, 2
    params1 = make_params(keys[0:13], Cin, Cout)
    x1 = jax.random.normal(keys[13], (N, Cin, H, W), jnp.float32)
    ref1 = reference_forward(x1, params1, stride)

    out1 = jax.block_until_ready(
        resnet_block_forward(x1, params1, stride, compute_dtype=jnp.float32))
    assert out1.shape == ref1.shape, (out1.shape, ref1.shape)
    assert float(jnp.max(jnp.abs(out1 - ref1))) < 1e-4

    # Same block on the (default) bf16 MXU path: f32 accumulation / f32 epilogue
    out1_bf16 = jax.block_until_ready(
        resnet_block_forward(x1, params1, stride, compute_dtype=jnp.bfloat16))
    assert float(jnp.max(jnp.abs(out1_bf16 - ref1))) < 5e-2

    # Case 2: stride=1 block (identity bypass added in the kernel epilogue)
    C2 = 8
    params2 = make_params(keys[14:27], C2, C2)
    x2 = jax.random.normal(keys[27], (N, C2, H, W), jnp.float32)
    ref2 = reference_forward(x2, params2, 1)

    out2 = jax.block_until_ready(
        resnet_block_forward(x2, params2, 1, compute_dtype=jnp.float32))
    assert out2.shape == ref2.shape, (out2.shape, ref2.shape)
    assert float(jnp.max(jnp.abs(out2 - ref2))) < 1e-4

    # bf16 default path on the identity-bypass block too
    out2_bf16 = jax.block_until_ready(resnet_block_forward(x2, params2, 1))
    assert float(jnp.max(jnp.abs(out2_bf16 - ref2))) < 5e-2

    print("KERNEL_OK")
</pallas_src>

<mosaic_0001>
module attributes {stable_mosaic.version = 11 : i64} {
  func.func @kernel(%arg0: i32, %arg1: memref<128x128xf32, #tpu.memory_space<vmem>>, %arg2: memref<128x128xf32, #tpu.memory_space<vmem>>, %arg3: memref<1x128xf32, #tpu.memory_space<vmem>>, %arg4: memref<1x128xf32, #tpu.memory_space<vmem>>, %arg5: memref<128x128xf32, #tpu.memory_space<vmem>>) attributes {dimension_semantics = [#tpu.dimension_semantics<parallel>], iteration_bounds = array<i64: 1>, scalar_prefetch = 0 : i64, scratch_operands = 0 : i64, tpu.core_type = #tpu.core_type<tc>, window_params = [{transform_indices = @transform_0, window_bounds = array<i64: 128, 128>}, {pipeline_mode = #tpu.pipeline_mode<synchronous>, transform_indices = @transform_1, window_bounds = array<i64: 128, 128>}, {pipeline_mode = #tpu.pipeline_mode<synchronous>, transform_indices = @transform_2, window_bounds = array<i64: 1, 128>}, {pipeline_mode = #tpu.pipeline_mode<synchronous>, transform_indices = @transform_3, window_bounds = array<i64: 1, 128>}, {transform_indices = @transform_4, window_bounds = array<i64: 128, 128>}]} {
    %c0 = arith.constant 0 : index
    %c0_0 = arith.constant 0 : index
    %0 = vector.load %arg1[%c0, %c0_0] : memref<128x128xf32, #tpu.memory_space<vmem>>, vector<128x128xf32>
    %c0_1 = arith.constant 0 : index
    %c0_2 = arith.constant 0 : index
    %1 = vector.load %arg2[%c0_1, %c0_2] : memref<128x128xf32, #tpu.memory_space<vmem>>, vector<128x128xf32>
    %cst = arith.constant dense<0.000000e+00> : vector<128x128xf32>
    %2 = tpu.matmul %0, %1, %cst {dimension_numbers = #tpu.dot_dimension_numbers<[1], [0], [0], [1], [0, 0, 1, 1], [], []>} : vector<128x128xf32>, vector<128x128xf32>, vector<128x128xf32> -> vector<128x128xf32>
    %c0_3 = arith.constant 0 : index
    %c0_4 = arith.constant 0 : index
    %3 = vector.load %arg3[%c0_3, %c0_4] : memref<1x128xf32, #tpu.memory_space<vmem>>, vector<1x128xf32>
    %4 = vector.broadcast %3 : vector<1x128xf32> to vector<128x128xf32>
    %5 = arith.mulf %2, %4 : vector<128x128xf32>
    %c0_5 = arith.constant 0 : index
    %c0_6 = arith.constant 0 : index
    %6 = vector.load %arg4[%c0_5, %c0_6] : memref<1x128xf32, #tpu.memory_space<vmem>>, vector<1x128xf32>
    %7 = vector.broadcast %6 : vector<1x128xf32> to vector<128x128xf32>
    %8 = arith.addf %5, %7 : vector<128x128xf32>
    %c0_7 = arith.constant 0 : index
    %c0_8 = arith.constant 0 : index
    %9 = vector.load %arg5[%c0_7, %c0_8] : memref<128x128xf32, #tpu.memory_space<vmem>>, vector<128x128xf32>
    tpu.vector_store %arg5[%c0_7, %c0_8], %8 {strides = array<i32>} : memref<128x128xf32, #tpu.memory_space<vmem>>, vector<128x128xf32>,
    return
  }
  func.func @transform_0(%arg0: i32) -> (i32, i32) {
    %c0_i32 = arith.constant 0 : i32
    %c0_i32_0 = arith.constant 0 : i32
    return %arg0, %c0_i32 : i32, i32
  }
  func.func @transform_1(%arg0: i32) -> (i32, i32) {
    %c0_i32 = arith.constant 0 : i32
    %c0_i32_0 = arith.constant 0 : i32
    %c0_i32_1 = arith.constant 0 : i32
    return %c0_i32, %c0_i32_0 : i32, i32
  }
  func.func @transform_2(%arg0: i32) -> (i32, i32) {
    %c0_i32 = arith.constant 0 : i32
    %c0_i32_0 = arith.constant 0 : i32
    %c0_i32_1 = arith.constant 0 : i32
    return %c0_i32, %c0_i32_0 : i32, i32
  }
  func.func @transform_3(%arg0: i32) -> (i32, i32) {
    %c0_i32 = arith.constant 0 : i32
    %c0_i32_0 = arith.constant 0 : i32
    %c0_i32_1 = arith.constant 0 : i32
    return %c0_i32, %c0_i32_0 : i32, i32
  }
  func.func @transform_4(%arg0: i32) -> (i32, i32) {
    %c0_i32 = arith.constant 0 : i32
    %c0_i32_0 = arith.constant 0 : i32
    return %arg0, %c0_i32 : i32, i32
  }
}

</mosaic_0001>

<bundles_post_ra>
// kernel: tpu_custom_call.1
= control target key start
LH: loop header
LB: loop body
LE: loop exit
PB: predicated region body
PF: predicated region fallthrough
CT: control target
= control target key end

     0   :  { %9 = vsyncpa [#allocation3], 0  ;;  %s599_s0 = inlined_call_operand.hbm [shape: f32[128,128], index: 0, kind: input, shape index: {}]   ;;  %s600_s1 = inlined_call_operand.hbm [shape: f32[128,128], index: 1, kind: input, shape index: {}]   ;;  %s601_s2 = inlined_call_operand.vmem [shape: f32[1,128], index: 2, kind: input, shape index: {}]   ;;  %s602_s3 = inlined_call_operand.vmem [shape: f32[1,128], index: 3, kind: input, shape index: {}]   ;;  %s603_s4 = inlined_call_operand.hbm [shape: f32[128,128], index: 4, kind: output, shape index: {}]  }
   0x1   :  { %10 = vsyncpa [#allocation6], 0 }
   0x2   :  { %11 = vsyncpa [#allocation4], 0  ;;  %s518_s15 = smov [#allocation2]   ;;  %s446_s19 = scalar_lea.hbm %s599_s0, 2048 }
   0x3   :  { %s17_s16 = sshll.u32 %s518_s15, 4  ;;  %p447_p0 = scmp.ne.s32.totalorder %s599_s0, %s446_s19  ;;  %s18_s16 = int_to_ptr.vmem [resolvable:$true] %s17_s16 }
   0x4   :  { %p450_p1 = scmp.lt.u32.totalorder %s446_s19, %s599_s0 }
   0x6   :  { %p452_p2 = pnand %p450_p1, %p447_p0 }
   0x8   :  { %455 = shalt.err (!%p452_p2)
}
   0x9   :  { %s456_s24 = scalar_lea.vmem %s18_s16, 2048  ;;  %p461_p4 = scmp.lt.s32.totalorder %s18_s16, %s18_s16 }
   0xa   :  { %p457_p3 = scmp.ne.s32.totalorder %s18_s16, %s456_s24  ;;  %p462_p5 = scmp.lt.s32.totalorder %s456_s24, %s456_s24 }
   0xc   :  { %p463_p6 = por %p462_p5, %p461_p4 }
   0xe   :  { %p464_p7 = pnand %p463_p6, %p457_p3 }
  0x10   :  { %467 = shalt.err (!%p464_p7)
}
  0x11   :  { %s519_s25 = smov 128   ;;  %s520_s26 = smov 8  }
  0x12   :  { %23 = dma.hbm_to_vmem [thread:$0]  %s599_s0, 2048, %s18_s16, [#allocation3], %s519_s25, %s519_s25, %s520_s26  }
  0x13   :  { %s521_s29 = smov [#allocation5]   ;;  %s468_s7 = scalar_lea.hbm %s600_s1, 2048 }
  0x14   :  { %s29_s30 = sshll.u32 %s521_s29, 4  ;;  %p469_p8 = scmp.ne.s32.totalorder %s600_s1, %s468_s7  ;;  %s30_s30 = int_to_ptr.vmem [resolvable:$true] %s29_s30 }
  0x15   :  { %p472_p9 = scmp.lt.u32.totalorder %s468_s7, %s600_s1 }
  0x17   :  { %p474_p10 = pnand %p472_p9, %p469_p8 }
  0x19   :  { %477 = shalt.err (!%p474_p10)
}
  0x1a   :  { %s478_s12 = scalar_lea.vmem %s30_s30, 2048  ;;  %p483_p12 = scmp.lt.s32.totalorder %s30_s30, %s30_s30 }
  0x1b   :  { %p479_p11 = scmp.ne.s32.totalorder %s30_s30, %s478_s12  ;;  %p484_p13 = scmp.lt.s32.totalorder %s478_s12, %s478_s12 }
  0x1d   :  { %p485_p0 = por %p484_p13, %p483_p12 }
  0x1f   :  { %p486_p1 = pnand %p485_p0, %p479_p11 }
  0x21   :  { %489 = shalt.err (!%p486_p1)
}
  0x22   :  { %35 = dma.hbm_to_vmem [thread:$0]  %s600_s1, 2048, %s30_s30, [#allocation6], %s519_s25, %s519_s25, %s520_s26  }
  0x23   :  { %512 = dma.done.wait [#allocation3], 2048  }
  0x24   :  { %513 = vsyncadd [#allocation3], 4294965248 }
  0x25   :  { %514 = dma.done.wait [#allocation6], 2048  }
  0x26   :  { %515 = vsyncadd [#allocation6], 4294965248  ;;  %v62_v0 = vld [vmem:[#allocation5] sm:$0xff]  ;;  %v63_v1 = vld [vmem:[#allocation5 + $0x8] sm:$0xff] }
  0x27   :  { %v64_v2 = vld [vmem:[#allocation5 + $0x10] sm:$0xff]  ;;  %v393_v3 = vpack.c.bf16 %v63_v1, %v62_v0  ;;  %v65_v4 = vld [vmem:[#allocation5 + $0x18] sm:$0xff]  ;;  %v66_v6 = vld [vmem:[#allocation5 + $0x20] sm:$0xff] }
  0x28   :  { %v397_v5 = vpack.c.bf16 %v65_v4, %v64_v2  ;;  %v67_v7 = vld [vmem:[#allocation5 + $0x28] sm:$0xff]  ;;  %v46_v9 = vld [vmem:[#allocation2] sm:$0xff]  ;;  %v68_v11 = vld [vmem:[#allocation5 + $0x30] sm:$0xff] }
  0x29   :  { %394 = vmatprep.subr.bf16.mxu0 %v393_v3  ;;  %425 = vmatprep.subr.bf16.mxu1 %v393_v3  ;;  %v401_v8 = vpack.c.bf16 %v67_v7, %v66_v6  ;;  %v54_v10 = vld [vmem:[#allocation2 + $0x40] sm:$0xff]  ;;  %v69_v12 = vld [vmem:[#allocation5 + $0x38] sm:$0xff]  ;;  %v71_v15 = vld [vmem:[#allocation5 + $0x48] sm:$0xff] }
  0x2a   :  { %396 = vmatpush3.bf16.msra.mxu0 %v393_v3  ;;  %433 = vmatpush3.bf16.msra.mxu1 %v393_v3  ;;  %v405_v13 = vpack.c.bf16 %v69_v12, %v68_v11  ;;  %v70_v14 = vld [vmem:[#allocation5 + $0x40] sm:$0xff]  ;;  %v72_v17 = vld [vmem:[#allocation5 + $0x50] sm:$0xff]  ;;  %v73_v18 = vld [vmem:[#allocation5 + $0x58] sm:$0xff] }
  0x2b   :  { %398 = vmatprep.subr.bf16.mxu0 %v397_v5  ;;  %426 = vmatprep.subr.bf16.mxu1 %v397_v5  ;;  %v409_v16 = vpack.c.bf16 %v71_v15, %v70_v14  ;;  %v413_v19 = vpack.c.bf16 %v73_v18, %v72_v17  ;;  %v74_v20 = vld [vmem:[#allocation5 + $0x60] sm:$0xff]  ;;  %v75_v21 = vld [vmem:[#allocation5 + $0x68] sm:$0xff]  ;;  %v76_v23 = vld [vmem:[#allocation5 + $0x70] sm:$0xff] }
  0x2c   :  { %369 = vmatprep.mubr.f32.mxu0 %v46_v9  ;;  %381 = vmatprep.mubr.f32.mxu1 %v54_v10  ;;  %v417_v22 = vpack.c.bf16 %v75_v21, %v74_v20  ;;  %v77_v24 = vld [vmem:[#allocation5 + $0x78] sm:$0xff]  ;;  %v47_v26 = vld [vmem:[#allocation2 + $0x8] sm:$0xff]  ;;  %v48_v28 = vld [vmem:[#allocation2 + $0x10] sm:$0xff] }
  0x2d   :  { %v421_v25 = vpack.c.bf16 %v77_v24, %v76_v23  ;;  %v55_v27 = vld [vmem:[#allocation2 + $0x48] sm:$0xff]  ;;  %v56_v29 = vld [vmem:[#allocation2 + $0x50] sm:$0xff]  ;;  %v49_v30 = vld [vmem:[#allocation2 + $0x18] sm:$0xff] }
  0x2e   :  { %400 = vmatpush3.bf16.msra.mxu0 %v397_v5  ;;  %434 = vmatpush3.bf16.msra.mxu1 %v397_v5  ;;  %v57_v31 = vld [vmem:[#allocation2 + $0x58] sm:$0xff]  ;;  %v50_v32 = vld [vmem:[#allocation2 + $0x20] sm:$0xff]  ;;  %v51_v34 = vld [vmem:[#allocation2 + $0x28] sm:$0xff] }
  0x2f   :  { %402 = vmatprep.subr.bf16.mxu0 %v401_v8  ;;  %427 = vmatprep.subr.bf16.mxu1 %v401_v8  ;;  %v58_v33 = vld [vmem:[#allocation2 + $0x60] sm:$0xff]  ;;  %v59_v35 = vld [vmem:[#allocation2 + $0x68] sm:$0xff]  ;;  %v52_v36 = vld [vmem:[#allocation2 + $0x30] sm:$0xff] }
  0x30   :  { %v60_v37 = vld [vmem:[#allocation2 + $0x70] sm:$0xff]  ;;  %v53_v38 = vld [vmem:[#allocation2 + $0x38] sm:$0xff]  ;;  %v303_v40 = vld [vmem:[%s601_s2] ss:$0 sm:$0xff]  ;;  %s522_s2 = smov [#allocation7]  }
  0x31   :  { %v61_v39 = vld [vmem:[#allocation2 + $0x78] sm:$0xff]  ;;  %v304_v42 = vld [vmem:[%s602_s3] ss:$0 sm:$0xff]  ;;  %s290_s3 = sshll.u32 %s522_s2, 4  ;;  %s291_s3 = int_to_ptr.vmem [resolvable:$true] %s290_s3 }
  0x32   :  { %404 = vmatpush3.bf16.msra.mxu0 %v401_v8  ;;  %435 = vmatpush3.bf16.msra.mxu1 %v401_v8  ;;  %s490_s17 = scalar_lea.vmem %s291_s3, 2048  ;;  %p495_p3 = scmp.lt.s32.totalorder %s291_s3, %s291_s3 }
  0x33   :  { %406 = vmatprep.subr.bf16.mxu0 %v405_v13  ;;  %428 = vmatprep.subr.bf16.mxu1 %v405_v13  ;;  %p491_p2 = scmp.ne.s32.totalorder %s291_s3, %s490_s17  ;;  %p496_p4 = scmp.lt.s32.totalorder %s490_s17, %s490_s17 }
  0x35   :  { %p497_p5 = por %p496_p4, %p495_p3 }
  0x36   :  { %408 = vmatpush3.bf16.msra.mxu0 %v405_v13  ;;  %436 = vmatpush3.bf16.msra.mxu1 %v405_v13 }
  0x37   :  { %410 = vmatprep.subr.bf16.mxu0 %v409_v16  ;;  %429 = vmatprep.subr.bf16.mxu1 %v409_v16  ;;  %p498_p6 = pnand %p497_p5, %p491_p2 }
  0x3a   :  { %412 = vmatpush3.bf16.msra.mxu0 %v409_v16  ;;  %437 = vmatpush3.bf16.msra.mxu1 %v409_v16 }
  0x3b   :  { %414 = vmatprep.subr.bf16.mxu0 %v413_v19  ;;  %430 = vmatprep.subr.bf16.mxu1 %v413_v19 }
  0x3e   :  { %416 = vmatpush3.bf16.msra.mxu0 %v413_v19  ;;  %438 = vmatpush3.bf16.msra.mxu1 %v413_v19 }
  0x3f   :  { %418 = vmatprep.subr.bf16.mxu0 %v417_v22  ;;  %431 = vmatprep.subr.bf16.mxu1 %v417_v22 }
  0x42   :  { %420 = vmatpush3.bf16.msra.mxu0 %v417_v22  ;;  %439 = vmatpush3.bf16.msra.mxu1 %v417_v22 }
  0x43   :  { %422 = vmatprep.subr.bf16.mxu0 %v421_v25  ;;  %432 = vmatprep.subr.bf16.mxu1 %v421_v25 }
  0x46   :  { %424 = vmatpush3.bf16.msra.mxu0 %v421_v25  ;;  %440 = vmatpush3.bf16.msra.mxu1 %v421_v25 }
  0x49   :  { %370 = vmatmul.mubr.f32.vlgmr.msra.gmra.mrb[0].mxu0 %v47_v26  ;;  %382 = vmatmul.mubr.f32.vlgmr.msra.gmra.mrb[0].mxu1 %v55_v27 }
  0x4a   :  { %372 = vmatprep.mubr.f32.mxu0 %v48_v28  ;;  %384 = vmatprep.mubr.f32.mxu1 %v56_v29 }
  0x4d   :  { %373 = vmatmul.mubr.f32.gmra.mrb[2].mxu0 %v49_v30  ;;  %385 = vmatmul.mubr.f32.gmra.mrb[2].mxu1 %v57_v31 }
  0x4e   :  { %375 = vmatprep.mubr.f32.mxu0 %v50_v32  ;;  %387 = vmatprep.mubr.f32.mxu1 %v58_v33 }
  0x51   :  { %376 = vmatmul.mubr.f32.gmra.mrb[4].mxu0 %v51_v34  ;;  %388 = vmatmul.mubr.f32.gmra.mrb[4].mxu1 %v59_v35 }
  0x52   :  { %378 = vmatprep.mubr.f32.mxu0 %v52_v36  ;;  %390 = vmatprep.mubr.f32.mxu1 %v60_v37 }
  0x55   :  { %379 = vmatmul.mubr.f32.gmra.mrb[6].mxu0 %v53_v38  ;;  %391 = vmatmul.mubr.f32.gmra.mrb[6].mxu1 %v61_v39 }
 0x11c   :  { %v371_v41 = vpop.f32.mrb[0].mxu0  ;;  %v383_v43 = vpop.f32.mrb[0].mxu1 }
 0x11d   :  { %v231_v44 = vmul.f32 %v371_v41, %v303_v40  ;;  %v239_v45 = vmul.f32 %v383_v43, %v303_v40  ;;  %v144_v46 = vpop.f32.mrb[1].mxu0  ;;  %v184_v47 = vpop.f32.mrb[1].mxu1 }
 0x11e   :  { %v230_v48 = vmul.f32 %v303_v40, %v144_v46  ;;  %v238_v49 = vmul.f32 %v303_v40, %v184_v47 }
 0x11f   :  { %v254_v50 = vadd.f32 %v304_v42, %v231_v44  ;;  %v262_v51 = vadd.f32 %v304_v42, %v239_v45 }
 0x120   :  { %v253_v52 = vadd.f32 %v304_v42, %v230_v48  ;;  %v261_v53 = vadd.f32 %v304_v42, %v238_v49  ;;  %v374_v54 = vpop.f32.mrb[2].mxu0  ;;  %v386_v55 = vpop.f32.mrb[2].mxu1 }
 0x121   :  { %270 = vst [vmem:[#allocation7 + $0x8] sm:$0xff] %v254_v50  ;;  %278 = vst [vmem:[#allocation7 + $0x48] sm:$0xff] %v262_v51  ;;  %v233_v56 = vmul.f32 %v374_v54, %v303_v40  ;;  %v241_v57 = vmul.f32 %v386_v55, %v303_v40  ;;  %v154_v58 = vpop.f32.mrb[3].mxu0  ;;  %v194_v59 = vpop.f32.mrb[3].mxu1 }
 0x122   :  { %269 = vst [vmem:[#allocation7] sm:$0xff] %v253_v52  ;;  %277 = vst [vmem:[#allocation7 + $0x40] sm:$0xff] %v261_v53  ;;  %v232_v60 = vmul.f32 %v303_v40, %v154_v58  ;;  %v240_v61 = vmul.f32 %v303_v40, %v194_v59 }
 0x123   :  { %v256_v62 = vadd.f32 %v304_v42, %v233_v56  ;;  %v264_v63 = vadd.f32 %v304_v42, %v241_v57 }
 0x124   :  { %v255_v0 = vadd.f32 %v304_v42, %v232_v60  ;;  %v263_v1 = vadd.f32 %v304_v42, %v240_v61  ;;  %v377_v2 = vpop.f32.mrb[4].mxu0  ;;  %v389_v3 = vpop.f32.mrb[4].mxu1 }
 0x125   :  { %272 = vst [vmem:[#allocation7 + $0x18] sm:$0xff] %v256_v62  ;;  %280 = vst [vmem:[#allocation7 + $0x58] sm:$0xff] %v264_v63  ;;  %v235_v4 = vmul.f32 %v377_v2, %v303_v40  ;;  %v243_v5 = vmul.f32 %v389_v3, %v303_v40  ;;  %v164_v6 = vpop.f32.mrb[5].mxu0  ;;  %v204_v7 = vpop.f32.mrb[5].mxu1 }
 0x126   :  { %271 = vst [vmem:[#allocation7 + $0x10] sm:$0xff] %v255_v0  ;;  %279 = vst [vmem:[#allocation7 + $0x50] sm:$0xff] %v263_v1  ;;  %v234_v8 = vmul.f32 %v303_v40, %v164_v6  ;;  %v242_v9 = vmul.f32 %v303_v40, %v204_v7 }
 0x127   :  { %v258_v10 = vadd.f32 %v304_v42, %v235_v4  ;;  %v266_v11 = vadd.f32 %v304_v42, %v243_v5 }
 0x128   :  { %v257_v12 = vadd.f32 %v304_v42, %v234_v8  ;;  %v265_v13 = vadd.f32 %v304_v42, %v242_v9  ;;  %v380_v14 = vpop.f32.mrb[6].mxu0  ;;  %v392_v15 = vpop.f32.mrb[6].mxu1 }
 0x129   :  { %274 = vst [vmem:[#allocation7 + $0x28] sm:$0xff] %v258_v10  ;;  %282 = vst [vmem:[#allocation7 + $0x68] sm:$0xff] %v266_v11  ;;  %v237_v16 = vmul.f32 %v380_v14, %v303_v40  ;;  %v245_v17 = vmul.f32 %v392_v15, %v303_v40  ;;  %v174_v18 = vpop.f32.mrb[7].mxu0  ;;  %v214_v19 = vpop.f32.mrb[7].mxu1 }
 0x12a   :  { %273 = vst [vmem:[#allocation7 + $0x20] sm:$0xff] %v257_v12  ;;  %281 = vst [vmem:[#allocation7 + $0x60] sm:$0xff] %v265_v13  ;;  %v236_v20 = vmul.f32 %v303_v40, %v174_v18  ;;  %v244_v21 = vmul.f32 %v303_v40, %v214_v19 }
 0x12b   :  { %v260_v22 = vadd.f32 %v304_v42, %v237_v16  ;;  %v268_v23 = vadd.f32 %v304_v42, %v245_v17 }
 0x12c   :  { %v259_v24 = vadd.f32 %v304_v42, %v236_v20  ;;  %v267_v25 = vadd.f32 %v304_v42, %v244_v21 }
 0x12d   :  { %276 = vst [vmem:[#allocation7 + $0x38] sm:$0xff] %v260_v22  ;;  %284 = vst [vmem:[#allocation7 + $0x78] sm:$0xff] %v268_v23 }
 0x12e   :  { %275 = vst [vmem:[#allocation7 + $0x30] sm:$0xff] %v259_v24  ;;  %283 = vst [vmem:[#allocation7 + $0x70] sm:$0xff] %v267_v25 }
 0x12f   :  { %501 = shalt.err (!%p498_p6)
}
 0x130   :  { %s502_s20 = scalar_lea.hbm %s603_s4, 2048 }
 0x131   :  { %p503_p7 = scmp.ne.s32.totalorder %s603_s4, %s502_s20  ;;  %p506_p8 = scmp.lt.u32.totalorder %s502_s20, %s603_s4 }
 0x133   :  { %p508_p9 = pnand %p506_p8, %p503_p7 }
 0x135   :  { %511 = shalt.err (!%p508_p9)
}
 0x136   :  { %296 = dma.vmem_to_hbm [thread:$0]  %s291_s3, 2048, %s603_s4, [#allocation4], %s519_s25, %s519_s25, %s520_s26  }
 0x137   :  { %516 = dma.done.wait [#allocation4], 2048  }
 0x138   :  { %517 = vsyncadd [#allocation4], 4294965248 }
 0x139   :  { %300 = vsyncpa [#allocation3], 1 }
 0x13a   :  { %301 = vsyncpa [#allocation6], 1 }
 0x13b   :  { %302 = vsyncpa [#allocation4], 1 }

</bundles_post_ra>
